<compile_context>
chip_gen: v7x
topology: tpu7x:2x2x1
jax: 0.10.0
libtpu: 0.0.40
codegen_flags: <defaults>
</compile_context>

<pallas_src>
import functools

import jax
import jax.numpy as jnp
from jax.experimental import pallas as pl
from jax.experimental.pallas import tpu as pltpu

LN_EPS = 1e-5  # PyTorch nn.LayerNorm default


def _image_proj_kernel(x_ref, w_ref, b_ref, gamma_ref, beta_ref, seg_ref, segt_ref,
                       o_ref, *, inv_d):
    # x_ref:     (B, C_in)        f32 activations (whole array, constant over grid)
    # w_ref:     (C_in, n_tile)   bf16 weight tile, columns in t-major (t*D + d) order
    # b_ref:     (1, n_tile)      f32 bias tile
    # gamma_ref: (1, n_tile)      f32 LayerNorm scale, pre-tiled per token
    # beta_ref:  (1, n_tile)      f32 LayerNorm shift, pre-tiled per token
    # seg_ref:   (n_tile, t_tile) f32 one-hot column->token segment matrix
    # segt_ref:  (t_tile, n_tile) its transpose (token->columns broadcast)
    # o_ref:     (B, n_tile)      lane-dense output tile
    x = x_ref[...]
    w = w_ref[...].astype(jnp.float32)
    y = jnp.dot(x, w, preferred_element_type=jnp.float32) + b_ref[...]     # (B, n_tile)

    seg = seg_ref[...]
    segt = segt_ref[...]
    # Per-token mean/variance over each D-wide chunk via small MXU matmuls so the
    # whole LN epilogue stays on lane-dense 2-D tiles (no in-kernel reshape).
    mean_t = jnp.dot(y, seg, preferred_element_type=jnp.float32) * inv_d   # (B, t_tile)
    mean = jnp.dot(mean_t, segt, preferred_element_type=jnp.float32)       # (B, n_tile)
    centered = y - mean
    var_t = jnp.dot(centered * centered, seg,
                    preferred_element_type=jnp.float32) * inv_d            # (B, t_tile)
    var = jnp.dot(var_t, segt, preferred_element_type=jnp.float32)         # (B, n_tile)
    y_norm = centered * jax.lax.rsqrt(var + LN_EPS)
    o_ref[...] = (y_norm * gamma_ref[...] + beta_ref[...]).astype(o_ref.dtype)


def prepare_image_proj_params(proj_w, proj_b, ln_gamma, ln_beta,
                              *, clip_extra_context_tokens, cross_attention_dim,
                              weight_dtype=jnp.bfloat16):
    """One-time (parameter-load time) re-layout of the PyTorch parameters.

    proj_w: (T*D, C_in) nn.Linear layout; proj_b: (T*D,); ln_gamma/ln_beta: (D,).
    Returns kernel-ready params:
      w       (C_in, T*D) weight_dtype   columns already in t-major (t*D + d) order
      b       (1, T*D)    f32
      gamma_t (1, T*D)    f32            LN scale tiled per token
      beta_t  (1, T*D)    f32            LN shift tiled per token
    """
    T = clip_extra_context_tokens
    D = cross_attention_dim
    w = jnp.asarray(proj_w).T.astype(weight_dtype)                    # (C_in, T*D)
    b = jnp.asarray(proj_b, dtype=jnp.float32).reshape(1, T * D)
    gamma_t = jnp.tile(jnp.asarray(ln_gamma, dtype=jnp.float32), T).reshape(1, T * D)
    beta_t = jnp.tile(jnp.asarray(ln_beta, dtype=jnp.float32), T).reshape(1, T * D)
    return w, b, gamma_t, beta_t


def image_proj_model(image_embeds, w, b, gamma_t, beta_t,
                     *, clip_extra_context_tokens, cross_attention_dim,
                     n_tile=None):
    """image_embeds: (B, C_in) f32. Params from prepare_image_proj_params().
    Returns (B, tokens, cross_attention_dim), matching the PyTorch module."""
    B, C_in = image_embeds.shape
    T = clip_extra_context_tokens
    D = cross_attention_dim
    N = T * D
    assert w.shape == (C_in, N)

    if n_tile is None:
        n_tile = N  # whole weight resident in VMEM -> single grid step
    assert N % n_tile == 0 and n_tile % D == 0
    assert n_tile == N or n_tile % 128 == 0, "weight tiles must be lane-aligned"
    t_tile = n_tile // D
    grid = (N // n_tile,)

    # Tiny 0/1 segment matrix mapping output column -> token within a tile
    # (identical for every tile because n_tile is a multiple of D).
    col_token = jnp.arange(n_tile, dtype=jnp.int32) // D
    seg = (col_token[:, None] == jnp.arange(t_tile, dtype=jnp.int32)[None, :]
           ).astype(jnp.float32)                                       # (n_tile, t_tile)
    segt = seg.T                                                       # (t_tile, n_tile)

    kernel = functools.partial(_image_proj_kernel, inv_d=1.0 / D)

    out_flat = pl.pallas_call(
        kernel,
        out_shape=jax.ShapeDtypeStruct((B, N), image_embeds.dtype),
        grid_spec=pltpu.PrefetchScalarGridSpec(
            num_scalar_prefetch=0,
            grid=grid,
            in_specs=[
                pl.BlockSpec((B, C_in), lambda n: (0, 0)),        # activations
                pl.BlockSpec((C_in, n_tile), lambda n: (0, n)),   # weight tile (bf16)
                pl.BlockSpec((1, n_tile), lambda n: (0, n)),      # bias tile
                pl.BlockSpec((1, n_tile), lambda n: (0, n)),      # gamma (pre-tiled)
                pl.BlockSpec((1, n_tile), lambda n: (0, n)),      # beta (pre-tiled)
                pl.BlockSpec((n_tile, t_tile), lambda n: (0, 0)),  # segment matrix
                pl.BlockSpec((t_tile, n_tile), lambda n: (0, 0)),  # its transpose
            ],
            out_specs=pl.BlockSpec((B, n_tile), lambda n: (0, n)),
        ),
        compiler_params=pltpu.CompilerParams(
            # Only >1 step when the weight is N-tiled; then v7x's 2 TCs split it.
            dimension_semantics=("parallel",)),
    )(image_embeds, w, b, gamma_t, beta_t, seg, segt)

    # Free, contiguous reshape back to the PyTorch (B, tokens, D) convention.
    return out_flat.reshape(B, T, D)


def _reference(image_embeds, w_cin_n, proj_b, ln_gamma, ln_beta, T, D):
    # Pure-JAX reference using the same (already bf16-quantized) weight so the
    # check isolates kernel numerics from the deliberate weight-storage cast.
    y = image_embeds @ w_cin_n.astype(jnp.float32) + proj_b
    y = y.reshape(-1, T, D).astype(jnp.float32)
    mean = jnp.mean(y, axis=-1, keepdims=True)
    var = jnp.mean((y - mean) ** 2, axis=-1, keepdims=True)
    yn = (y - mean) / jnp.sqrt(var + LN_EPS)
    return yn * ln_gamma + ln_beta


if __name__ == "__main__":
    # Small shapes consistent with the module's forward.
    batch = 2
    clip_embeddings_dim = 64       # C_in
    cross_attention_dim = 32       # D
    clip_extra_context_tokens = 4  # T   -> T*D = 128 lane-dense output columns

    key = jax.random.PRNGKey(0)
    k_x, k_w, k_b, k_g, k_beta = jax.random.split(key, 5)

    image_embeds = jax.random.normal(
        k_x, (batch, clip_embeddings_dim), dtype=jnp.float32)

    # PyTorch-layout synthetic parameters (Linear: (out_features, in_features)).
    out_features = clip_extra_context_tokens * cross_attention_dim
    proj_w = jax.random.normal(
        k_w, (out_features, clip_embeddings_dim), dtype=jnp.float32) * 0.02
    proj_b = jax.random.normal(k_b, (out_features,), dtype=jnp.float32) * 0.01
    ln_gamma = 1.0 + 0.1 * jax.random.normal(
        k_g, (cross_attention_dim,), dtype=jnp.float32)
    ln_beta = 0.1 * jax.random.normal(
        k_beta, (cross_attention_dim,), dtype=jnp.float32)

    # One-time parameter re-layout ("parameter-load time", not per forward call).
    w_k, b_k, gamma_k, beta_k = prepare_image_proj_params(
        proj_w, proj_b, ln_gamma, ln_beta,
        clip_extra_context_tokens=clip_extra_context_tokens,
        cross_attention_dim=cross_attention_dim)

    out = image_proj_model(
        image_embeds, w_k, b_k, gamma_k, beta_k,
        clip_extra_context_tokens=clip_extra_context_tokens,
        cross_attention_dim=cross_attention_dim)
    out = jax.block_until_ready(out)

    ref = _reference(image_embeds, w_k, proj_b, ln_gamma, ln_beta,
                     clip_extra_context_tokens, cross_attention_dim)

    assert out.shape == (batch, clip_extra_context_tokens, cross_attention_dim)
    assert jnp.allclose(out, ref, atol=2e-4, rtol=2e-4), "mismatch vs reference"

    print("KERNEL_OK")
</pallas_src>

<mosaic_0001>
module attributes {stable_mosaic.version = 11 : i64} {
  func.func @_image_proj_kernel(%arg0: i32, %arg1: memref<2x64xf32, #tpu.memory_space<vmem>>, %arg2: memref<64x128xbf16, #tpu.memory_space<vmem>>, %arg3: memref<1x128xf32, #tpu.memory_space<vmem>>, %arg4: memref<1x128xf32, #tpu.memory_space<vmem>>, %arg5: memref<1x128xf32, #tpu.memory_space<vmem>>, %arg6: memref<128x4xf32, #tpu.memory_space<vmem>>, %arg7: memref<4x128xf32, #tpu.memory_space<vmem>>, %arg8: memref<2x128xf32, #tpu.memory_space<vmem>>) attributes {dimension_semantics = [#tpu.dimension_semantics<parallel>], iteration_bounds = array<i64: 1>, scalar_prefetch = 0 : i64, scratch_operands = 0 : i64, tpu.core_type = #tpu.core_type<tc>, window_params = [{pipeline_mode = #tpu.pipeline_mode<synchronous>, transform_indices = @transform_0, window_bounds = array<i64: 2, 64>}, {transform_indices = @transform_1, window_bounds = array<i64: 64, 128>}, {transform_indices = @transform_2, window_bounds = array<i64: 1, 128>}, {transform_indices = @transform_3, window_bounds = array<i64: 1, 128>}, {transform_indices = @transform_4, window_bounds = array<i64: 1, 128>}, {pipeline_mode = #tpu.pipeline_mode<synchronous>, transform_indices = @transform_5, window_bounds = array<i64: 128, 4>}, {pipeline_mode = #tpu.pipeline_mode<synchronous>, transform_indices = @transform_6, window_bounds = array<i64: 4, 128>}, {transform_indices = @transform_7, window_bounds = array<i64: 2, 128>}]} {
    %c0 = arith.constant 0 : index
    %c0_0 = arith.constant 0 : index
    %0 = vector.load %arg1[%c0, %c0_0] : memref<2x64xf32, #tpu.memory_space<vmem>>, vector<2x64xf32>
    %c0_1 = arith.constant 0 : index
    %c0_2 = arith.constant 0 : index
    %1 = vector.load %arg2[%c0_1, %c0_2] : memref<64x128xbf16, #tpu.memory_space<vmem>>, vector<64x128xbf16>
    %2 = arith.extf %1 : vector<64x128xbf16> to vector<64x128xf32>
    %cst = arith.constant dense<0.000000e+00> : vector<2x128xf32>
    %3 = tpu.matmul %0, %2, %cst {dimension_numbers = #tpu.dot_dimension_numbers<[1], [0], [0], [1], [0, 0, 1, 1], [], []>} : vector<2x64xf32>, vector<64x128xf32>, vector<2x128xf32> -> vector<2x128xf32>
    %c0_3 = arith.constant 0 : index
    %c0_4 = arith.constant 0 : index
    %4 = vector.load %arg3[%c0_3, %c0_4] : memref<1x128xf32, #tpu.memory_space<vmem>>, vector<1x128xf32>
    %5 = vector.broadcast %4 : vector<1x128xf32> to vector<2x128xf32>
    %6 = arith.addf %3, %5 : vector<2x128xf32>
    %c0_5 = arith.constant 0 : index
    %c0_6 = arith.constant 0 : index
    %7 = vector.load %arg6[%c0_5, %c0_6] : memref<128x4xf32, #tpu.memory_space<vmem>>, vector<128x4xf32>
    %c0_7 = arith.constant 0 : index
    %c0_8 = arith.constant 0 : index
    %8 = vector.load %arg7[%c0_7, %c0_8] : memref<4x128xf32, #tpu.memory_space<vmem>>, vector<4x128xf32>
    %cst_9 = arith.constant dense<0.000000e+00> : vector<2x4xf32>
    %9 = tpu.matmul %6, %7, %cst_9 {dimension_numbers = #tpu.dot_dimension_numbers<[1], [0], [0], [1], [0, 0, 1, 1], [], []>} : vector<2x128xf32>, vector<128x4xf32>, vector<2x4xf32> -> vector<2x4xf32>
    %cst_10 = arith.constant 3.125000e-02 : f32
    %10 = vector.broadcast %cst_10 : f32 to vector<2x4xf32>
    %11 = arith.mulf %9, %10 : vector<2x4xf32>
    %cst_11 = arith.constant dense<0.000000e+00> : vector<2x128xf32>
    %12 = tpu.matmul %11, %8, %cst_11 {dimension_numbers = #tpu.dot_dimension_numbers<[1], [0], [0], [1], [0, 0, 1, 1], [], []>} : vector<2x4xf32>, vector<4x128xf32>, vector<2x128xf32> -> vector<2x128xf32>
    %13 = arith.subf %6, %12 : vector<2x128xf32>
    %14 = arith.mulf %13, %13 : vector<2x128xf32>
    %cst_12 = arith.constant dense<0.000000e+00> : vector<2x4xf32>
    %15 = tpu.matmul %14, %7, %cst_12 {dimension_numbers = #tpu.dot_dimension_numbers<[1], [0], [0], [1], [0, 0, 1, 1], [], []>} : vector<2x128xf32>, vector<128x4xf32>, vector<2x4xf32> -> vector<2x4xf32>
    %cst_13 = arith.constant 3.125000e-02 : f32
    %16 = vector.broadcast %cst_13 : f32 to vector<2x4xf32>
    %17 = arith.mulf %15, %16 : vector<2x4xf32>
    %cst_14 = arith.constant dense<0.000000e+00> : vector<2x128xf32>
    %18 = tpu.matmul %17, %8, %cst_14 {dimension_numbers = #tpu.dot_dimension_numbers<[1], [0], [0], [1], [0, 0, 1, 1], [], []>} : vector<2x4xf32>, vector<4x128xf32>, vector<2x128xf32> -> vector<2x128xf32>
    %cst_15 = arith.constant 9.99999974E-6 : f32
    %19 = vector.broadcast %cst_15 : f32 to vector<2x128xf32>
    %20 = arith.addf %18, %19 : vector<2x128xf32>
    %21 = math.rsqrt %20 : vector<2x128xf32>
    %22 = arith.mulf %13, %21 : vector<2x128xf32>
    %c0_16 = arith.constant 0 : index
    %c0_17 = arith.constant 0 : index
    %23 = vector.load %arg4[%c0_16, %c0_17] : memref<1x128xf32, #tpu.memory_space<vmem>>, vector<1x128xf32>
    %24 = vector.broadcast %23 : vector<1x128xf32> to vector<2x128xf32>
    %25 = arith.mulf %22, %24 : vector<2x128xf32>
    %c0_18 = arith.constant 0 : index
    %c0_19 = arith.constant 0 : index
    %26 = vector.load %arg5[%c0_18, %c0_19] : memref<1x128xf32, #tpu.memory_space<vmem>>, vector<1x128xf32>
    %27 = vector.broadcast %26 : vector<1x128xf32> to vector<2x128xf32>
    %28 = arith.addf %25, %27 : vector<2x128xf32>
    %c0_20 = arith.constant 0 : index
    %c0_21 = arith.constant 0 : index
    %29 = vector.load %arg8[%c0_20, %c0_21] : memref<2x128xf32, #tpu.memory_space<vmem>>, vector<2x128xf32>
    tpu.vector_store %arg8[%c0_20, %c0_21], %28 {strides = array<i32>} : memref<2x128xf32, #tpu.memory_space<vmem>>, vector<2x128xf32>,
    return
  }
  func.func @transform_0(%arg0: i32) -> (i32, i32) {
    %c0_i32 = arith.constant 0 : i32
    %c0_i32_0 = arith.constant 0 : i32
    %c0_i32_1 = arith.constant 0 : i32
    return %c0_i32, %c0_i32_0 : i32, i32
  }
  func.func @transform_1(%arg0: i32) -> (i32, i32) {
    %c0_i32 = arith.constant 0 : i32
    %c0_i32_0 = arith.constant 0 : i32
    return %c0_i32, %arg0 : i32, i32
  }
  func.func @transform_2(%arg0: i32) -> (i32, i32) {
    %c0_i32 = arith.constant 0 : i32
    %c0_i32_0 = arith.constant 0 : i32
    return %c0_i32, %arg0 : i32, i32
  }
  func.func @transform_3(%arg0: i32) -> (i32, i32) {
    %c0_i32 = arith.constant 0 : i32
    %c0_i32_0 = arith.constant 0 : i32
    return %c0_i32, %arg0 : i32, i32
  }
  func.func @transform_4(%arg0: i32) -> (i32, i32) {
    %c0_i32 = arith.constant 0 : i32
    %c0_i32_0 = arith.constant 0 : i32
    return %c0_i32, %arg0 : i32, i32
  }
  func.func @transform_5(%arg0: i32) -> (i32, i32) {
    %c0_i32 = arith.constant 0 : i32
    %c0_i32_0 = arith.constant 0 : i32
    %c0_i32_1 = arith.constant 0 : i32
    return %c0_i32, %c0_i32_0 : i32, i32
  }
  func.func @transform_6(%arg0: i32) -> (i32, i32) {
    %c0_i32 = arith.constant 0 : i32
    %c0_i32_0 = arith.constant 0 : i32
    %c0_i32_1 = arith.constant 0 : i32
    return %c0_i32, %c0_i32_0 : i32, i32
  }
  func.func @transform_7(%arg0: i32) -> (i32, i32) {
    %c0_i32 = arith.constant 0 : i32
    %c0_i32_0 = arith.constant 0 : i32
    return %c0_i32, %arg0 : i32, i32
  }
}

</mosaic_0001>

<bundles_post_ra>
// kernel: tpu_custom_call.1
= control target key start
LH: loop header
LB: loop body
LE: loop exit
PB: predicated region body
PF: predicated region fallthrough
CT: control target
= control target key end

     0   :  { %v733_v1 = vmov 0.0|0.0   ;;  %vm734_vm0 = vmmov 0   ;;  %v735_v2 = vmov 0.0   ;;  %s896_s0 = inlined_call_operand.vmem [shape: f32[2,64], index: 0, kind: input, shape index: {}]   ;;  %s897_s1 = inlined_call_operand.vmem [shape: bf16[64,128], index: 1, kind: input, shape index: {}]   ;;  %s898_s2 = inlined_call_operand.vmem [shape: f32[1,128], index: 2, kind: input, shape index: {}]   ;;  %s899_s3 = inlined_call_operand.vmem [shape: f32[1,128], index: 3, kind: input, shape index: {}]   ;;  %s900_s4 = inlined_call_operand.vmem [shape: f32[1,128], index: 4, kind: input, shape index: {}]   ;;  %s901_s5 = inlined_call_operand.vmem [shape: f32[128,4], index: 5, kind: input, shape index: {}]   ;;  %s902_s6 = inlined_call_operand.vmem [shape: f32[4,128], index: 6, kind: input, shape index: {}]   ;;  %s903_s7 = inlined_call_operand.hbm [shape: f32[2,128], index: 7, kind: output, shape index: {}]  }
   0x1   :  { %v479_v0 = vld [vmem:[%s897_s1] sm:$0xff]   ;;  %643 = vmatprep.subr.bf16.mxu0 %v733_v1  ;;  %560 = vmatprep.mubr.msk.f32.mxu0 %vm734_vm0, %v735_v2  ;;  %v126_v4 = vld [vmem:[%s901_s5 + $0x8] sm:$0xff]  ;;  %v127_v5 = vld [vmem:[%s901_s5 + $0x10] sm:$0xff] }
   0x2   :  { %v125_v3 = vld [vmem:[%s901_s5] sm:$0xff]  ;;  %645 = vmatpush3.bf16.msra.mxu0 %v479_v0  ;;  %655 = vmatprep.subr.bf16.mxu1 %v733_v1  ;;  %v128_v6 = vld [vmem:[%s901_s5 + $0x18] sm:$0xff]  ;;  %v494_v7 = vld [vmem:[%s897_s1 + $0x8] sm:$0xff]  }
   0x3   :  { %646 = vmatprep.subr.bf16.mxu0 %v733_v1  ;;  %v656_v8 = vpack.c.bf16 %v126_v4, %v125_v3  ;;  %595 = vmatprep.mubr.msk.f32.mxu1 %vm734_vm0, %v735_v2  ;;  %v659_v9 = vpack.c.bf16 %v128_v6, %v127_v5  ;;  %v129_v10 = vld [vmem:[%s901_s5 + $0x20] sm:$0xff]  ;;  %v130_v11 = vld [vmem:[%s901_s5 + $0x28] sm:$0xff] }
   0x5   :  { %657 = vmatpush3.bf16.msra.mxu1 %v656_v8 }
   0x6   :  { %648 = vmatpush3.bf16.msra.mxu0 %v494_v7  ;;  %658 = vmatprep.subr.bf16.mxu1 %v733_v1 }
   0x7   :  { %12 = vsyncpa [#allocation3], 0  ;;  %649 = vmatprep.subr.bf16.mxu0 %v733_v1  ;;  %v495_v12 = vld [vmem:[%s897_s1 + $0x10] sm:$0xff]   ;;  %v662_v13 = vpack.c.bf16 %v130_v11, %v129_v10  ;;  %v132_v15 = vld [vmem:[%s901_s5 + $0x38] sm:$0xff]  ;;  %vm51_vm1 = vcmask 523264   ;;  %vm217_vm2 = vcmask 1043456  }
   0x8   :  { %v131_v14 = vld [vmem:[%s901_s5 + $0x30] sm:$0xff]  ;;  %v496_v16 = vld [vmem:[%s897_s1 + $0x18] sm:$0xff]   ;;  %v27_v18 = vld [vmem:[%s896_s0] sm:$0x3]  ;;  %vm213_vm3 = vcmask 31744   ;;  %s736_s23 = smov [#allocation2]  }
   0x9   :  { %660 = vmatpush3.bf16.msra.mxu1 %v659_v9  ;;  %v665_v17 = vpack.c.bf16 %v132_v15, %v131_v14  ;;  %v133_v19 = vld [vmem:[%s901_s5 + $0x40] sm:$0xff]  ;;  %v134_v20 = vld [vmem:[%s901_s5 + $0x48] sm:$0xff]  ;;  %v135_v22 = vld [vmem:[%s901_s5 + $0x50] sm:$0xff]  ;;  %s462_s24 = sshll.u32 %s736_s23, 4  ;;  %s463_s24 = int_to_ptr.vmem [resolvable:$true] %s462_s24 }
   0xa   :  { %651 = vmatpush3.bf16.msra.mxu0 %v495_v12  ;;  %661 = vmatprep.subr.bf16.mxu1 %v733_v1  ;;  %v668_v21 = vpack.c.bf16 %v134_v20, %v133_v19  ;;  %v136_v23 = vld [vmem:[%s901_s5 + $0x58] sm:$0xff]  ;;  %v137_v25 = vld [vmem:[%s901_s5 + $0x60] sm:$0xff]  ;;  %v138_v26 = vld [vmem:[%s901_s5 + $0x68] sm:$0xff]  ;;  %s709_s25 = scalar_lea.vmem %s463_s24, 32  ;;  %p714_p1 = scmp.lt.s32.totalorder %s463_s24, %s463_s24 }
   0xb   :  { %652 = vmatprep.subr.bf16.mxu0 %v733_v1  ;;  %v671_v24 = vpack.c.bf16 %v136_v23, %v135_v22  ;;  %v674_v27 = vpack.c.bf16 %v138_v26, %v137_v25  ;;  %v139_v28 = vld [vmem:[%s901_s5 + $0x70] sm:$0xff]  ;;  %v140_v29 = vld [vmem:[%s901_s5 + $0x78] sm:$0xff]  ;;  %v470_v31 = vld [vmem:[%s898_s2] ss:$0 sm:$0xff]  ;;  %p710_p0 = scmp.ne.s32.totalorder %s463_s24, %s709_s25  ;;  %p715_p2 = scmp.lt.s32.totalorder %s709_s25, %s709_s25 }
   0xc   :  { %v677_v30 = vpack.c.bf16 %v140_v29, %v139_v28  ;;  %v141_v35 = vld [vmem:[%s902_s6] sm:$0xf] }
   0xd   :  { %663 = vmatpush3.bf16.msra.mxu1 %v662_v13  ;;  %v476_v50 = vld [vmem:[%s899_s3] ss:$0 sm:$0xff]  ;;  %p716_p3 = por %p715_p2, %p714_p1 }
   0xe   :  { %654 = vmatpush3.bf16.msra.mxu0 %v496_v16  ;;  %664 = vmatprep.subr.bf16.mxu1 %v733_v1  ;;  %v477_v52 = vld [vmem:[%s900_s4] ss:$0 sm:$0xff] }
   0xf   :  { %679 = vmatprep.subr.bf16.mxu0 %v733_v1  ;;  %p717_p4 = pnand %p716_p3, %p710_p0 }
  0x11   :  { %561 = vmatmul.mubr.msk.f32.vlgmr.msra.gmra.mrb[0].mxu0 %vm51_vm1, %v27_v18  ;;  %666 = vmatpush3.bf16.msra.mxu1 %v665_v17 }
  0x12   :  { %667 = vmatprep.subr.bf16.mxu1 %v733_v1  ;;  %681 = vmatpush3.bf16.msra.mxu0 %v656_v8 }
  0x13   :  { %682 = vmatprep.subr.bf16.mxu0 %v733_v1  ;;  %635 = vmatprep.mubr.msk.f32.mxu0 %vm734_vm0, %v735_v2 }
  0x15   :  { %669 = vmatpush3.bf16.msra.mxu1 %v668_v21 }
  0x16   :  { %670 = vmatprep.subr.bf16.mxu1 %v733_v1  ;;  %684 = vmatpush3.bf16.msra.mxu0 %v659_v9 }
  0x17   :  { %685 = vmatprep.subr.bf16.mxu0 %v733_v1 }
  0x19   :  { %672 = vmatpush3.bf16.msra.mxu1 %v671_v24 }
  0x1a   :  { %673 = vmatprep.subr.bf16.mxu1 %v733_v1  ;;  %687 = vmatpush3.bf16.msra.mxu0 %v662_v13 }
  0x1b   :  { %688 = vmatprep.subr.bf16.mxu0 %v733_v1 }
  0x1d   :  { %675 = vmatpush3.bf16.msra.mxu1 %v674_v27 }
  0x1e   :  { %676 = vmatprep.subr.bf16.mxu1 %v733_v1  ;;  %690 = vmatpush3.bf16.msra.mxu0 %v665_v17 }
  0x1f   :  { %691 = vmatprep.subr.bf16.mxu0 %v733_v1 }
  0x21   :  { %678 = vmatpush3.bf16.msra.mxu1 %v677_v30 }
  0x22   :  { %693 = vmatpush3.bf16.msra.mxu0 %v668_v21  ;;  %598 = vmatprep.subr.mxu1 %v735_v2 }
  0x23   :  { %694 = vmatprep.subr.bf16.mxu0 %v733_v1 }
  0x26   :  { %696 = vmatpush3.bf16.msra.mxu0 %v671_v24 }
  0x27   :  { %697 = vmatprep.subr.bf16.mxu0 %v733_v1 }
  0x2a   :  { %699 = vmatpush3.bf16.msra.mxu0 %v674_v27 }
  0x2b   :  { %700 = vmatprep.subr.bf16.mxu0 %v733_v1 }
  0x2e   :  { %702 = vmatpush3.bf16.msra.mxu0 %v677_v30 }
  0xe4   :  { %v121_v32 = vpop.f32.mrb[0].mxu0 }
  0xe5   :  { %v122_v33 = vadd.f32 %v470_v31, %v121_v32  ;;  %v562_v34 = vpop.f32.mrb[1].mxu0 }
  0xe7   :  { %596 = vmatmul.mubr.f32.vlgmr.msra.gmra.mrb[0].mxu1 %v122_v33 }
  0xe8   :  { %599 = vmatpush3.msk.msra.mxu1 %vm217_vm2, %v141_v35  ;;  %600 = vmatprep.mubr.msk.f32.mxu1 %vm734_vm0, %v735_v2 }
  0xe9   :  { %638 = vmatprep.subr.mxu1 %v735_v2 }
 0x1ba   :  { %v208_v36 = vpop.f32.mrb[0].mxu1 }
 0x1bb   :  { %v212_v37 = vmul.f32 0.03125, %v208_v36  ;;  %v597_v38 = vpop.f32.mrb[1].mxu1 }
 0x1bd   :  { %601 = vmatmul.mubr.msk.f32.vlgmr.msra.gmra.mrb[2].mxu1 %vm213_vm3, %v212_v37 }
 0x1be   :  { %639 = vmatpush3.msk.msra.mxu1 %vm217_vm2, %v141_v35  ;;  %640 = vmatprep.mubr.msk.f32.mxu1 %vm734_vm0, %v735_v2 }
 0x290   :  { %v287_v39 = vpop.f32.mrb[2].mxu1 }
 0x291   :  { %v291_v40 = vsub.f32 %v122_v33, %v287_v39  ;;  %v602_v41 = vpop.f32.mrb[3].mxu1 }
 0x293   :  { %v292_v42 = vmul.f32 %v291_v40, %v291_v40 }
 0x295   :  { %636 = vmatmul.mubr.f32.vlgmr.msra.gmra.mrb[2].mxu0 %v292_v42 }
 0x368   :  { %v359_v43 = vpop.f32.mrb[2].mxu0 }
 0x369   :  { %v363_v44 = vmul.f32 0.03125, %v359_v43  ;;  %v637_v45 = vpop.f32.mrb[3].mxu0 }
 0x36b   :  { %641 = vmatmul.mubr.msk.f32.vlgmr.msra.gmra.mrb[4].mxu1 %vm213_vm3, %v363_v44 }
 0x43e   :  { %v433_v46 = vpop.f32.mrb[4].mxu1 }
 0x43f   :  { %v434_v47 = vadd.f32 1e-05, %v433_v46  ;;  %v642_v48 = vpop.f32.mrb[5].mxu1 }
 0x441   :  { %707 = vrsqrt.f32 %v434_v47 }
 0x44b   :  { %v708_v49 = vpop.eup %707 }
 0x44c   :  { %v438_v51 = vmul.f32 %v708_v49, %v291_v40 }
 0x44e   :  { %v446_v53 = vmul.f32 %v476_v50, %v438_v51 }
 0x450   :  { %v454_v54 = vadd.f32 %v477_v52, %v446_v53 }
 0x452   :  { %455 = vst [vmem:[#allocation2] sm:$0x3] %v454_v54 }
 0x453   :  { %720 = shalt.err (!%p717_p4)
}
 0x454   :  { %s721_s27 = scalar_lea.hbm %s903_s7, 32 }
 0x455   :  { %p722_p5 = scmp.ne.s32.totalorder %s903_s7, %s721_s27  ;;  %p725_p6 = scmp.lt.u32.totalorder %s721_s27, %s903_s7 }
 0x457   :  { %p727_p7 = pnand %p725_p6, %p722_p5 }
 0x459   :  { %730 = shalt.err (!%p727_p7)
}
 0x45a   :  { %465 = dma.vmem_to_hbm [thread:$0]  %s463_s24, 32, %s903_s7, [#allocation3]  }
 0x45b   :  { %731 = dma.done.wait [#allocation3], 32  }
 0x45c   :  { %732 = vsyncadd [#allocation3], 4294967264 }
 0x45d   :  { %469 = vsyncpa [#allocation3], 1 }

</bundles_post_ra>
